<compile_context>
chip_gen: v7x
topology: tpu7x:2x2x1
jax: 0.10.0
libtpu: 0.0.40
codegen_flags: <defaults>
</compile_context>

<pallas_src>
import functools

import jax
import jax.numpy as jnp
from jax.experimental import pallas as pl
from jax.experimental.pallas import tpu as pltpu


def _round_up(x, m):
    return (x + m - 1) // m * m


def _cdiv(a, b):
    return (a + b - 1) // b


def _pick_tiling(B, tb_target):
    """Pick (tb, Bp, num_tiles): tb multiple of 128, Bp = tb * num_tiles >= B.

    Pads the batch only to a multiple of 128 (never to a multiple of tb unless
    unavoidable) and prefers a tile count that divides the 128-granule count
    exactly.  num_tiles >= 2 whenever B > 128 so the "parallel" grid axis can
    use both v7x TensorCores (harmless on single-TC v5e/v6e).
    """
    tb_target = max(128, int(tb_target))
    Bp128 = _round_up(B, 128)
    n128 = Bp128 // 128
    want = max(_cdiv(Bp128, tb_target), 2 if n128 >= 2 else 1)
    # Prefer an exact divisor of n128 (zero extra padding); otherwise round the
    # tile up, which pads < 128 columns per tile.
    num_tiles = next(
        (d for d in range(want, min(2 * want, n128) + 1) if n128 % d == 0), want
    )
    tb = 128 * _cdiv(n128, num_tiles)
    return tb, tb * num_tiles, num_tiles


def pack_params(w1, b1, w2, b2):
    """Pack (w1, b1, w2, b2) into one (8,128)-aligned f32 slab (single resident DMA).

    Layout:  rows [0 : H)     : cols [0 : S) = w1.T , col S = b1
             rows [H : H + A) : cols [0 : H) = w2.T , col H = b2
    """
    S, H = w1.shape
    A = w2.shape[1]
    assert S + 1 <= 128 and H + 1 <= 128, "packing assumes no_states, hidden < 128"
    rows = _round_up(H + A, 8)
    slab = jnp.zeros((rows, 128), jnp.float32)
    slab = slab.at[:H, :S].set(w1.T.astype(jnp.float32))
    slab = slab.at[:H, S].set(b1.reshape(-1).astype(jnp.float32))
    slab = slab.at[H:H + A, :H].set(w2.T.astype(jnp.float32))
    slab = slab.at[H:H + A, H].set(b2.reshape(-1).astype(jnp.float32))
    return slab


def _vpg_kernel(S, H, A, layer1, x_ref, p_ref, o_ref):
    # x_ref: (S, TB)  state tile, batch on lanes (f32 or bf16 in HBM)
    # p_ref: (Rp,128) packed parameter slab (resident, constant index_map)
    # o_ref: (A, TB)  logits tile, batch on lanes
    x = x_ref[...].astype(jnp.float32)     # compute in f32 (v5e has no bf16 VPU/EUP)
    p = p_ref[...]
    w1t = p[:H, :S]                         # (H, S)
    b1 = p[:H, S:S + 1]                     # (H, 1)
    w2t = p[H:H + A, :H]                    # (A, H)
    b2 = p[H:H + A, H:H + 1]                # (A, 1)

    if layer1 == "mxu":
        # K = S (tiny) contraction on the MXU: padded MXU FLOPs are free and the
        # VALU slot (the likely bind) stays clear.
        pre = jnp.dot(w1t, x, preferred_element_type=jnp.float32) + b1
    else:
        # VPU fallback (benchmark switch): S static outer-product multiply-adds.
        # TODO(synk): could use a stride-0 sublane-broadcast load of x rows here.
        pre = jnp.broadcast_to(b1, (H, x.shape[1]))
        for s in range(S):                  # static unroll, S is small (e.g. 4)
            pre = pre + w1t[:, s:s + 1] * x[s:s + 1, :]

    h = jnp.tanh(pre)                       # EUP slot, effectively free
    logits = jnp.dot(w2t, h, preferred_element_type=jnp.float32) + b2
    o_ref[...] = logits.astype(o_ref.dtype)


@functools.partial(jax.jit, static_argnames=("tb_target", "layer1"))
def vpg_forward_t(x_t, w1, b1, w2, b2, *, tb_target=32768, layer1="mxu"):
    """Lane-dense entry point (preferred): x_t (no_states, B) -> logits_t (no_actions, B).

    No wrapper transposes; no padding copy when B is a multiple of 128 and the
    chosen tile divides it (the common rollout-buffer case).
    tb_target: batch tile upper bound -- sweep 16384..65536; the explicit
    vmem_limit_bytes below keeps large tiles compiling on v5e as well.
    """
    S, B = x_t.shape
    assert w1.shape[0] == S
    H = w1.shape[1]
    A = w2.shape[1]

    slab = pack_params(w1, b1, w2, b2)
    Rp = slab.shape[0]

    tb, Bp, num_tiles = _pick_tiling(B, tb_target)
    if Bp != B:
        x_pad = jnp.zeros((S, Bp), x_t.dtype).at[:, :B].set(x_t)
    else:
        x_pad = x_t

    # Double-buffered state + output blocks, resident params, and headroom for
    # the compiler-materialized (H, tb) f32 intermediates.
    x_bytes = jnp.dtype(x_t.dtype).itemsize
    vmem_need = tb * (2 * S * x_bytes + 2 * A * 4 + 4 * H * 4) + 2 * Rp * 128 * 4
    vmem_limit = int(min(max(32 << 20, 2 * vmem_need), 40 << 20))

    kernel = functools.partial(_vpg_kernel, S, H, A, layer1)
    out = pl.pallas_call(
        kernel,
        out_shape=jax.ShapeDtypeStruct((A, Bp), jnp.float32),
        grid=(num_tiles,),
        in_specs=[
            pl.BlockSpec((S, tb), lambda i: (0, i)),     # state tiles stream in
            pl.BlockSpec((Rp, 128), lambda i: (0, 0)),   # packed params stay resident
        ],
        out_specs=pl.BlockSpec((A, tb), lambda i: (0, i)),
        compiler_params=pltpu.CompilerParams(
            dimension_semantics=("parallel",),           # shards tiles across v7x TCs
            vmem_limit_bytes=vmem_limit,
        ),
    )(x_pad, slab)

    return out if Bp == B else out[:, :B]


@functools.partial(jax.jit, static_argnames=("tb_target", "layer1"))
def vpg_forward(state, w1, b1, w2, b2, *, tb_target=32768, layer1="mxu"):
    """Torch-layout wrapper: state (B, no_states) -> logits (B, no_actions).

    Adds one layout-plumbing transpose on each side; keep the rollout buffer
    features-first and call vpg_forward_t to avoid those extra HBM passes.
    """
    logits_t = vpg_forward_t(state.T, w1, b1, w2, b2,
                             tb_target=tb_target, layer1=layer1)
    return logits_t.T


def init_vpg_params(key, no_states, no_actions, hidden=32):
    """Deterministic init matching torch.nn.Linear default U(-1/sqrt(fan_in), +)."""
    k1, k2, k3, k4 = jax.random.split(key, 4)
    bound1 = 1.0 / jnp.sqrt(no_states)
    bound2 = 1.0 / jnp.sqrt(hidden)
    w1 = jax.random.uniform(k1, (no_states, hidden), jnp.float32, -bound1, bound1)
    b1 = jax.random.uniform(k2, (1, hidden), jnp.float32, -bound1, bound1)
    w2 = jax.random.uniform(k3, (hidden, no_actions), jnp.float32, -bound2, bound2)
    b2 = jax.random.uniform(k4, (1, no_actions), jnp.float32, -bound2, bound2)
    return w1, b1, w2, b2


if __name__ == "__main__":
    key = jax.random.PRNGKey(0)
    k_params, k_s1, k_s2, k_s3 = jax.random.split(key, 4)

    no_states = 4      # e.g. CartPole observation dim
    no_actions = 2     # e.g. CartPole action dim
    w1, b1, w2, b2 = init_vpg_params(k_params, no_states, no_actions)

    def ref_fn(s):
        return jnp.tanh(s @ w1 + b1) @ w2 + b2

    # 1) Tiny batch through the torch-layout wrapper (single 128-lane tile).
    state = jax.random.normal(k_s1, (8, no_states), jnp.float32)
    logits = jax.block_until_ready(vpg_forward(state, w1, b1, w2, b2))
    assert logits.shape == (8, no_actions)
    assert jnp.allclose(logits, ref_fn(state), atol=1e-4), "mismatch (small batch)"

    # 2) Batched rollout through the lane-dense entry point: exact tiling
    #    (1024 = 4 x 256), multi-tile "parallel" grid, resident packed params,
    #    no wrapper transpose/pad passes.
    B2 = 1024
    x_t = jax.random.normal(k_s2, (no_states, B2), jnp.float32)
    logits_t = jax.block_until_ready(
        vpg_forward_t(x_t, w1, b1, w2, b2, tb_target=256))
    assert logits_t.shape == (no_actions, B2)
    assert jnp.allclose(logits_t.T, ref_fn(x_t.T), atol=1e-4), "mismatch (gridded)"

    # 3) Ragged batch (pads only to a multiple of 128, not of tb) with the VPU
    #    layer-1 fallback (benchmark switch).
    state3 = jax.random.normal(k_s3, (300, no_states), jnp.float32)
    logits3 = jax.block_until_ready(
        vpg_forward(state3, w1, b1, w2, b2, layer1="vpu"))
    assert logits3.shape == (300, no_actions)
    assert jnp.allclose(logits3, ref_fn(state3), atol=1e-4), "mismatch (vpu path)"

    # 4) bf16 state stream (halves state DMA bytes); compute stays f32 in-kernel.
    x_bf = x_t.astype(jnp.bfloat16)
    logits_bf = jax.block_until_ready(vpg_forward_t(x_bf, w1, b1, w2, b2))
    assert jnp.allclose(logits_bf.T, ref_fn(x_bf.astype(jnp.float32).T),
                        atol=1e-4), "mismatch (bf16 state)"

    # TODO(synk): Categorical sampling (get_action) and train_model's loss /
    # optimizer step are host-side ops, not part of the nn.Module forward, so
    # they are not kernelized here.
    print("KERNEL_OK")
</pallas_src>

<mosaic_0001>
module attributes {stable_mosaic.version = 11 : i64} {
  func.func @_vpg_kernel(%arg0: i32, %arg1: memref<4x128xf32, #tpu.memory_space<vmem>>, %arg2: memref<40x128xf32, #tpu.memory_space<vmem>>, %arg3: memref<2x128xf32, #tpu.memory_space<vmem>>) attributes {dimension_semantics = [#tpu.dimension_semantics<parallel>], iteration_bounds = array<i64: 1>, scalar_prefetch = 0 : i64, scratch_operands = 0 : i64, tpu.core_type = #tpu.core_type<tc>, window_params = [{transform_indices = @transform_0, window_bounds = array<i64: 4, 128>}, {pipeline_mode = #tpu.pipeline_mode<synchronous>, transform_indices = @transform_1, window_bounds = array<i64: 40, 128>}, {transform_indices = @transform_2, window_bounds = array<i64: 2, 128>}]} {
    %c0 = arith.constant 0 : index
    %c0_0 = arith.constant 0 : index
    %0 = vector.load %arg1[%c0, %c0_0] : memref<4x128xf32, #tpu.memory_space<vmem>>, vector<4x128xf32>
    %c0_1 = arith.constant 0 : index
    %c0_2 = arith.constant 0 : index
    %1 = vector.load %arg2[%c0_1, %c0_2] : memref<40x128xf32, #tpu.memory_space<vmem>>, vector<40x128xf32>
    %2 = vector.extract_strided_slice %1 {offsets = [0, 0], sizes = [32, 4], strides = [1, 1]} : vector<40x128xf32> to vector<32x4xf32>
    %3 = vector.extract_strided_slice %1 {offsets = [0, 4], sizes = [32, 1], strides = [1, 1]} : vector<40x128xf32> to vector<32x1xf32>
    %4 = vector.extract_strided_slice %1 {offsets = [32, 0], sizes = [2, 32], strides = [1, 1]} : vector<40x128xf32> to vector<2x32xf32>
    %5 = vector.extract_strided_slice %1 {offsets = [32, 32], sizes = [2, 1], strides = [1, 1]} : vector<40x128xf32> to vector<2x1xf32>
    %cst = arith.constant dense<0.000000e+00> : vector<32x128xf32>
    %6 = tpu.matmul %2, %0, %cst {dimension_numbers = #tpu.dot_dimension_numbers<[1], [0], [0], [1], [0, 0, 1, 1], [], []>} : vector<32x4xf32>, vector<4x128xf32>, vector<32x128xf32> -> vector<32x128xf32>
    %7 = vector.broadcast %3 : vector<32x1xf32> to vector<32x128xf32>
    %8 = arith.addf %6, %7 : vector<32x128xf32>
    %9 = math.tanh %8 : vector<32x128xf32>
    %cst_3 = arith.constant dense<0.000000e+00> : vector<2x128xf32>
    %10 = tpu.matmul %4, %9, %cst_3 {dimension_numbers = #tpu.dot_dimension_numbers<[1], [0], [0], [1], [0, 0, 1, 1], [], []>} : vector<2x32xf32>, vector<32x128xf32>, vector<2x128xf32> -> vector<2x128xf32>
    %11 = vector.broadcast %5 : vector<2x1xf32> to vector<2x128xf32>
    %12 = arith.addf %10, %11 : vector<2x128xf32>
    %c0_4 = arith.constant 0 : index
    %c0_5 = arith.constant 0 : index
    %13 = vector.load %arg3[%c0_4, %c0_5] : memref<2x128xf32, #tpu.memory_space<vmem>>, vector<2x128xf32>
    tpu.vector_store %arg3[%c0_4, %c0_5], %12 {strides = array<i32>} : memref<2x128xf32, #tpu.memory_space<vmem>>, vector<2x128xf32>,
    return
  }
  func.func @transform_0(%arg0: i32) -> (i32, i32) {
    %c0_i32 = arith.constant 0 : i32
    %c0_i32_0 = arith.constant 0 : i32
    return %c0_i32, %arg0 : i32, i32
  }
  func.func @transform_1(%arg0: i32) -> (i32, i32) {
    %c0_i32 = arith.constant 0 : i32
    %c0_i32_0 = arith.constant 0 : i32
    %c0_i32_1 = arith.constant 0 : i32
    return %c0_i32, %c0_i32_0 : i32, i32
  }
  func.func @transform_2(%arg0: i32) -> (i32, i32) {
    %c0_i32 = arith.constant 0 : i32
    %c0_i32_0 = arith.constant 0 : i32
    return %c0_i32, %arg0 : i32, i32
  }
}

</mosaic_0001>

<bundles_post_ra>
// kernel: vpg_forward_t.1
= control target key start
LH: loop header
LB: loop body
LE: loop exit
PB: predicated region body
PF: predicated region fallthrough
CT: control target
= control target key end

     0   :  { %vm47_vm0 = vcmask 1043456   ;;  %vm38_vm1 = vcmask 31744   ;;  %s366_s0 = inlined_call_operand.vmem [shape: f32[4,128], index: 0, kind: input, shape index: {}]   ;;  %s367_s1 = inlined_call_operand.vmem [shape: f32[40,128], index: 1, kind: input, shape index: {}]   ;;  %s368_s2 = inlined_call_operand.hbm [shape: f32[2,128], index: 2, kind: output, shape index: {}]  }
   0x1   :  { %v12_v0 = vld [vmem:[%s366_s0] sm:$0xf]  ;;  %v14_v2 = vld [vmem:[%s367_s1 + $0x8] sm:$0xff]  ;;  %v15_v3 = vld [vmem:[%s367_s1 + $0x10] sm:$0xff] }
   0x2   :  { %v13_v1 = vld [vmem:[%s367_s1] sm:$0xff]  ;;  %249 = vmatprep.subr.msk.mxu0 %vm47_vm0, %v12_v0 }
   0x3   :  { %251 = vmatprep.mubr.msk.f32.mxu0 %vm38_vm1, %v13_v1 }
   0x4   :  { %7 = vsyncpa [#allocation3], 0  ;;  %250 = vmatpush3.msk.msra.mxu0 %vm47_vm0, %v12_v0  ;;  %v315_v4 = vmov 4   ;;  %v16_v5 = vld [vmem:[%s367_s1 + $0x18] sm:$0xff]  ;;  %v316_v6 = vmov 0.0|0.0   ;;  %vm317_vm2 = vmmov 0  }
   0x5   :  { %280 = vset.pattern.permute.xlu0 %v315_v4  ;;  %252 = vmatmul.mubr.msk.f32.vlgmr.msra.gmra.mrb[0].mxu0 %vm38_vm1, %v14_v2  ;;  %v318_v7 = vmov 0.0   ;;  %v17_v8 = vld [vmem:[%s367_s1 + $0x20] sm:$0xff]  ;;  %v319_v9 = vmov 32   ;;  %vm145_vm3 = vcmask 261120   ;;  %s320_s1 = smov [#allocation2]  }
   0x6   :  { %20 = vperm.xlu0 %280, %v13_v1   ;;  %254 = vmatprep.mubr.msk.f32.mxu0 %vm38_vm1, %v15_v3  ;;  %s225_s20 = sshll.u32 %s320_s1, 4  ;;  %s226_s20 = int_to_ptr.vmem [resolvable:$true] %s225_s20 }
   0x7   :  { %281 = vset.pattern.permute.xlu1 %v315_v4  ;;  %268 = vmatprep.subr.bf16.mxu1 %v316_v6  ;;  %s291_s21 = scalar_lea.vmem %s226_s20, 32  ;;  %p296_p1 = scmp.lt.s32.totalorder %s226_s20, %s226_s20 }
   0x8   :  { %30 = vperm.xlu1 %281, %v15_v3   ;;  %265 = vmatprep.mubr.msk.f32.mxu1 %vm317_vm2, %v318_v7  ;;  %p292_p0 = scmp.ne.s32.totalorder %s226_s20, %s291_s21  ;;  %p297_p2 = scmp.lt.s32.totalorder %s291_s21, %s291_s21 }
   0x9   :  { %255 = vmatmul.mubr.msk.f32.gmra.mrb[2].mxu0 %vm38_vm1, %v16_v5 }
   0xa   :  { %25 = vperm.xlu0 %280, %v14_v2   ;;  %p298_p3 = por %p297_p2, %p296_p1 }
   0xc   :  { %35 = vperm.xlu1 %281, %v16_v5   ;;  %p299_p4 = pnand %p298_p3, %p292_p0 }
   0xe   :  { %282 = vset.pattern.permute.xlu0 %v319_v9 }
   0xf   :  { %142 = vperm.xlu0 %282, %v17_v8  }
  0x85   :  { %v21_v10 = vpop.permute.xlu0 %20 }
  0x87   :  { %v31_v11 = vpop.permute.xlu1 %30 }
  0x89   :  { %v26_v12 = vpop.permute.xlu0 %25 }
  0x8b   :  { %v36_v17 = vpop.permute.xlu1 %35 }
  0x8e   :  { %v143_v28 = vpop.permute.xlu0 %142 }
  0xd8   :  { %v253_v13 = vpop.f32.mrb[0].mxu0 }
  0xd9   :  { %v123_v14 = vadd.f32 %v253_v13, %v26_v12  ;;  %v117_v15 = vpop.f32.mrb[1].mxu0 }
  0xda   :  { %v118_v16 = vadd.f32 %v117_v15, %v21_v10 }
  0xdb   :  { %283 = vtanh.f32 %v123_v14 }
  0xdc   :  { %285 = vtanh.f32 %v118_v16  ;;  %v256_v18 = vpop.f32.mrb[2].mxu0 }
  0xdd   :  { %v133_v19 = vadd.f32 %v256_v18, %v36_v17  ;;  %v127_v20 = vpop.f32.mrb[3].mxu0 }
  0xde   :  { %v128_v21 = vadd.f32 %v127_v20, %v31_v11 }
  0xdf   :  { %287 = vtanh.f32 %v133_v19 }
  0xe0   :  { %289 = vtanh.f32 %v128_v21 }
  0xe5   :  { %v284_v22 = vpop.eup %283 }
  0xe6   :  { %v286_v23 = vpop.eup %285 }
  0xe7   :  { %v269_v24 = vpack.c.bf16 %v284_v22, %v286_v23 }
  0xe9   :  { %v288_v25 = vpop.eup %287  ;;  %270 = vmatpush3.bf16.msra.mxu1 %v269_v24 }
  0xea   :  { %v290_v26 = vpop.eup %289  ;;  %271 = vmatprep.subr.bf16.mxu1 %v316_v6 }
  0xeb   :  { %v272_v27 = vpack.c.bf16 %v288_v25, %v290_v26 }
  0xed   :  { %273 = vmatpush3.bf16.msra.mxu1 %v272_v27 }
  0xf0   :  { %266 = vmatmul.mubr.msk.f32.vlgmr.msra.gmra.mrb[0].mxu1 %vm145_vm3, %v17_v8 }
 0x1c3   :  { %v214_v29 = vpop.f32.mrb[0].mxu1 }
 0x1c4   :  { %v215_v30 = vadd.f32 %v214_v29, %v143_v28  ;;  %v267_v31 = vpop.f32.mrb[1].mxu1 }
 0x1c6   :  { %218 = vst [vmem:[#allocation2] sm:$0x3] %v215_v30 }
 0x1c7   :  { %302 = shalt.err (!%p299_p4)
}
 0x1c8   :  { %s303_s24 = scalar_lea.hbm %s368_s2, 32 }
 0x1c9   :  { %p304_p5 = scmp.ne.s32.totalorder %s368_s2, %s303_s24  ;;  %p307_p6 = scmp.lt.u32.totalorder %s303_s24, %s368_s2 }
 0x1cb   :  { %p309_p7 = pnand %p307_p6, %p304_p5 }
 0x1cd   :  { %312 = shalt.err (!%p309_p7)
}
 0x1ce   :  { %228 = dma.vmem_to_hbm [thread:$0]  %s226_s20, 32, %s368_s2, [#allocation3]  }
 0x1cf   :  { %313 = dma.done.wait [#allocation3], 32  }
 0x1d0   :  { %314 = vsyncadd [#allocation3], 4294967264 }
 0x1d1   :  { %232 = vsyncpa [#allocation3], 1 }

</bundles_post_ra>
